<compile_context>
chip_gen: v6e
topology: v6e:2x2x1
jax: 0.10.0
libtpu: 0.0.40
codegen_flags: <defaults>
</compile_context>

<pallas_src>
import jax
import jax.numpy as jnp
from jax.experimental import pallas as pl
from jax.experimental.pallas import tpu as pltpu


def _round_up(a: int, m: int) -> int:
    return (a + m - 1) // m * m


def _stat_net_kernel(x_ref, z_ref, v_ref,
                     w1p_ref, w1z_ref, b1_ref,
                     w2_ref, b2_ref,
                     w3r_ref, b3_ref,
                     out_ref):
    """One batch tile of T(x, z) = Linear(S(concat(x @ V, z)))."""
    # Manifold projection: (TILE_B, n) @ (n, d), bf16 operands, f32 accum.
    xp = jnp.dot(x_ref[...], v_ref[...], preferred_element_type=jnp.float32)
    xp = xp.astype(jnp.bfloat16)

    # Layer 1 (ConcatLayer fused): concat(xp, z) @ W1 == xp @ W1p + z @ W1z.
    h1 = jnp.dot(xp, w1p_ref[...], preferred_element_type=jnp.float32)
    h1 = h1 + jnp.dot(z_ref[...], w1z_ref[...],
                      preferred_element_type=jnp.float32)
    h1 = jnp.maximum(h1 + b1_ref[...], 0.0)          # bias + ReLU in f32

    # Layer 2.
    h2 = jnp.dot(h1.astype(jnp.bfloat16), w2_ref[...],
                 preferred_element_type=jnp.float32)
    h2 = jnp.maximum(h2 + b2_ref[...], 0.0)          # bias + ReLU in f32

    # Final Linear(H, 1): VPU multiply + lane reduce instead of an N=1 matmul.
    t = jnp.sum(h2 * w3r_ref[...], axis=-1, keepdims=True) + b3_ref[0, 0]
    out_ref[...] = t.astype(out_ref.dtype)


def manifold_statistics_forward(x, z, params, *, max_tile_b: int = 256):
    """ManifoldStatisticsNetwork.forward: returns T(x, z) of shape (B, 1)."""
    v, w1p, w1z, b1, w2, b2, w3_row, b3 = params
    B, n = x.shape
    dz = z.shape[1]
    d = v.shape[1]
    H = w2.shape[0]

    # Batch tile: multiple of 16 (bf16 sublane packing), modest size so four
    # double-buffered row streams stay far below even the v7x VMEM budget.
    tb = min(max_tile_b, _round_up(B, 16))
    b_pad = _round_up(B, tb)

    xb = jnp.pad(x.astype(jnp.bfloat16), ((0, b_pad - B), (0, 0)))
    zb = jnp.pad(z.astype(jnp.bfloat16), ((0, b_pad - B), (0, 0)))

    flops = 2 * b_pad * (n * d + (d + dz) * H + H * H + H)
    bytes_accessed = (
        b_pad * (n + dz) * 2                      # bf16 activations in
        + (n * d + (d + dz) * H + H * H) * 2      # bf16 weights
        + (2 * H + 1 + H) * 4                     # f32 biases + w3 row
        + b_pad * 4                               # f32 output
    )

    out = pl.pallas_call(
        _stat_net_kernel,
        out_shape=jax.ShapeDtypeStruct((b_pad, 1), jnp.float32),
        grid=(b_pad // tb,),
        in_specs=[
            pl.BlockSpec((tb, n), lambda i: (i, 0)),    # x tile
            pl.BlockSpec((tb, dz), lambda i: (i, 0)),   # z tile
            pl.BlockSpec((n, d), lambda i: (0, 0)),     # V (resident)
            pl.BlockSpec((d, H), lambda i: (0, 0)),     # W1 (proj part)
            pl.BlockSpec((dz, H), lambda i: (0, 0)),    # W1 (z part)
            pl.BlockSpec((1, H), lambda i: (0, 0)),     # b1
            pl.BlockSpec((H, H), lambda i: (0, 0)),     # W2
            pl.BlockSpec((1, H), lambda i: (0, 0)),     # b2
            pl.BlockSpec((1, H), lambda i: (0, 0)),     # W3 as a row
            pl.BlockSpec((1, 1), lambda i: (0, 0)),     # b3
        ],
        out_specs=pl.BlockSpec((tb, 1), lambda i: (i, 0)),
        compiler_params=pltpu.CompilerParams(
            dimension_semantics=("parallel",),
            vmem_limit_bytes=32 * 1024 * 1024,
        ),
        cost_estimate=pl.CostEstimate(
            flops=flops, transcendentals=0, bytes_accessed=bytes_accessed),
    )(xb, zb, v, w1p, w1z, b1, w2, b2, w3_row, b3)

    return out[:B]


def init_params(key, n, d, dz, hidden):
    """Deterministic synthetic parameters (nn.Linear-like init; orthonormal V)."""
    ks = jax.random.split(key, 7)
    # Orthonormal d-frame spanning the projection subspace.
    v, _ = jnp.linalg.qr(jax.random.normal(ks[0], (n, d), jnp.float32))
    s1 = 1.0 / jnp.sqrt(jnp.float32(d + dz))
    s2 = 1.0 / jnp.sqrt(jnp.float32(hidden))
    w1p = jax.random.uniform(ks[1], (d, hidden), jnp.float32, -s1, s1)
    w1z = jax.random.uniform(ks[2], (dz, hidden), jnp.float32, -s1, s1)
    b1 = jax.random.uniform(ks[3], (1, hidden), jnp.float32, -s1, s1)
    w2 = jax.random.uniform(ks[4], (hidden, hidden), jnp.float32, -s2, s2)
    b2 = jax.random.uniform(ks[5], (1, hidden), jnp.float32, -s2, s2)
    w3_row = jax.random.uniform(ks[6], (1, hidden), jnp.float32, -s2, s2)
    b3 = jnp.zeros((1, 1), jnp.float32)
    # bf16 for MXU operands; biases and the final (VPU) weight row stay f32.
    return (v.astype(jnp.bfloat16),
            w1p.astype(jnp.bfloat16), w1z.astype(jnp.bfloat16), b1,
            w2.astype(jnp.bfloat16), b2,
            w3_row, b3)


def _reference(x, z, params):
    """Pure-JAX reference with identical precision choices."""
    v, w1p, w1z, b1, w2, b2, w3_row, b3 = params
    xb = x.astype(jnp.bfloat16)
    zb = z.astype(jnp.bfloat16)
    xp = jnp.dot(xb, v, preferred_element_type=jnp.float32).astype(jnp.bfloat16)
    h1 = (jnp.dot(xp, w1p, preferred_element_type=jnp.float32)
          + jnp.dot(zb, w1z, preferred_element_type=jnp.float32))
    h1 = jnp.maximum(h1 + b1, 0.0)
    h2 = jnp.dot(h1.astype(jnp.bfloat16), w2,
                 preferred_element_type=jnp.float32)
    h2 = jnp.maximum(h2 + b2, 0.0)
    return jnp.sum(h2 * w3_row, axis=-1, keepdims=True) + b3[0, 0]


if __name__ == "__main__":
    B, N, D, DZ, HIDDEN = 8, 32, 16, 16, 32

    root = jax.random.PRNGKey(0)
    k_params, k_x, k_z = jax.random.split(root, 3)

    params = init_params(k_params, N, D, DZ, HIDDEN)
    x = jax.random.normal(k_x, (B, N), jnp.float32)
    z = jax.random.normal(k_z, (B, DZ), jnp.float32)

    out = jax.block_until_ready(manifold_statistics_forward(x, z, params))
    ref = jax.block_until_ready(_reference(x, z, params))

    assert out.shape == (B, 1), out.shape
    assert jnp.allclose(out, ref, atol=1e-4, rtol=1e-4), (out, ref)
    print("KERNEL_OK")
</pallas_src>

<mosaic_0001>
module attributes {stable_mosaic.version = 11 : i64} {
  func.func @_stat_net_kernel(%arg0: i32, %arg1: memref<16x32xbf16, #tpu.memory_space<vmem>>, %arg2: memref<16x16xbf16, #tpu.memory_space<vmem>>, %arg3: memref<32x16xbf16, #tpu.memory_space<vmem>>, %arg4: memref<16x32xbf16, #tpu.memory_space<vmem>>, %arg5: memref<16x32xbf16, #tpu.memory_space<vmem>>, %arg6: memref<1x32xf32, #tpu.memory_space<vmem>>, %arg7: memref<32x32xbf16, #tpu.memory_space<vmem>>, %arg8: memref<1x32xf32, #tpu.memory_space<vmem>>, %arg9: memref<1x32xf32, #tpu.memory_space<vmem>>, %arg10: memref<1x1xf32, #tpu.memory_space<vmem>>, %arg11: memref<16x1xf32, #tpu.memory_space<vmem>>) attributes {dimension_semantics = [#tpu.dimension_semantics<parallel>], iteration_bounds = array<i64: 1>, scalar_prefetch = 0 : i64, scratch_operands = 0 : i64, tpu.core_type = #tpu.core_type<tc>, window_params = [{transform_indices = @transform_0, window_bounds = array<i64: 16, 32>}, {transform_indices = @transform_1, window_bounds = array<i64: 16, 16>}, {pipeline_mode = #tpu.pipeline_mode<synchronous>, transform_indices = @transform_2, window_bounds = array<i64: 32, 16>}, {pipeline_mode = #tpu.pipeline_mode<synchronous>, transform_indices = @transform_3, window_bounds = array<i64: 16, 32>}, {pipeline_mode = #tpu.pipeline_mode<synchronous>, transform_indices = @transform_4, window_bounds = array<i64: 16, 32>}, {pipeline_mode = #tpu.pipeline_mode<synchronous>, transform_indices = @transform_5, window_bounds = array<i64: 1, 32>}, {pipeline_mode = #tpu.pipeline_mode<synchronous>, transform_indices = @transform_6, window_bounds = array<i64: 32, 32>}, {pipeline_mode = #tpu.pipeline_mode<synchronous>, transform_indices = @transform_7, window_bounds = array<i64: 1, 32>}, {pipeline_mode = #tpu.pipeline_mode<synchronous>, transform_indices = @transform_8, window_bounds = array<i64: 1, 32>}, {pipeline_mode = #tpu.pipeline_mode<synchronous>, transform_indices = @transform_9, window_bounds = array<i64: 1, 1>}, {transform_indices = @transform_10, window_bounds = array<i64: 16, 1>}]} {
    %c0 = arith.constant 0 : index
    %c0_0 = arith.constant 0 : index
    %0 = vector.load %arg1[%c0, %c0_0] : memref<16x32xbf16, #tpu.memory_space<vmem>>, vector<16x32xbf16>
    %c0_1 = arith.constant 0 : index
    %c0_2 = arith.constant 0 : index
    %1 = vector.load %arg3[%c0_1, %c0_2] : memref<32x16xbf16, #tpu.memory_space<vmem>>, vector<32x16xbf16>
    %cst = arith.constant dense<0.000000e+00> : vector<16x16xf32>
    %2 = tpu.matmul %0, %1, %cst {dimension_numbers = #tpu.dot_dimension_numbers<[1], [0], [0], [1], [0, 0, 1, 1], [], []>} : vector<16x32xbf16>, vector<32x16xbf16>, vector<16x16xf32> -> vector<16x16xf32>
    %3 = arith.truncf %2 : vector<16x16xf32> to vector<16x16xbf16>
    %c0_3 = arith.constant 0 : index
    %c0_4 = arith.constant 0 : index
    %4 = vector.load %arg4[%c0_3, %c0_4] : memref<16x32xbf16, #tpu.memory_space<vmem>>, vector<16x32xbf16>
    %cst_5 = arith.constant dense<0.000000e+00> : vector<16x32xf32>
    %5 = tpu.matmul %3, %4, %cst_5 {dimension_numbers = #tpu.dot_dimension_numbers<[1], [0], [0], [1], [0, 0, 1, 1], [], []>} : vector<16x16xbf16>, vector<16x32xbf16>, vector<16x32xf32> -> vector<16x32xf32>
    %c0_6 = arith.constant 0 : index
    %c0_7 = arith.constant 0 : index
    %6 = vector.load %arg2[%c0_6, %c0_7] : memref<16x16xbf16, #tpu.memory_space<vmem>>, vector<16x16xbf16>
    %c0_8 = arith.constant 0 : index
    %c0_9 = arith.constant 0 : index
    %7 = vector.load %arg5[%c0_8, %c0_9] : memref<16x32xbf16, #tpu.memory_space<vmem>>, vector<16x32xbf16>
    %cst_10 = arith.constant dense<0.000000e+00> : vector<16x32xf32>
    %8 = tpu.matmul %6, %7, %cst_10 {dimension_numbers = #tpu.dot_dimension_numbers<[1], [0], [0], [1], [0, 0, 1, 1], [], []>} : vector<16x16xbf16>, vector<16x32xbf16>, vector<16x32xf32> -> vector<16x32xf32>
    %9 = arith.addf %5, %8 : vector<16x32xf32>
    %c0_11 = arith.constant 0 : index
    %c0_12 = arith.constant 0 : index
    %10 = vector.load %arg6[%c0_11, %c0_12] : memref<1x32xf32, #tpu.memory_space<vmem>>, vector<1x32xf32>
    %11 = vector.broadcast %10 : vector<1x32xf32> to vector<16x32xf32>
    %12 = arith.addf %9, %11 : vector<16x32xf32>
    %cst_13 = arith.constant 0.000000e+00 : f32
    %13 = vector.broadcast %cst_13 : f32 to vector<16x32xf32>
    %14 = arith.maximumf %12, %13 : vector<16x32xf32>
    %15 = arith.truncf %14 : vector<16x32xf32> to vector<16x32xbf16>
    %c0_14 = arith.constant 0 : index
    %c0_15 = arith.constant 0 : index
    %16 = vector.load %arg7[%c0_14, %c0_15] : memref<32x32xbf16, #tpu.memory_space<vmem>>, vector<32x32xbf16>
    %cst_16 = arith.constant dense<0.000000e+00> : vector<16x32xf32>
    %17 = tpu.matmul %15, %16, %cst_16 {dimension_numbers = #tpu.dot_dimension_numbers<[1], [0], [0], [1], [0, 0, 1, 1], [], []>} : vector<16x32xbf16>, vector<32x32xbf16>, vector<16x32xf32> -> vector<16x32xf32>
    %c0_17 = arith.constant 0 : index
    %c0_18 = arith.constant 0 : index
    %18 = vector.load %arg8[%c0_17, %c0_18] : memref<1x32xf32, #tpu.memory_space<vmem>>, vector<1x32xf32>
    %19 = vector.broadcast %18 : vector<1x32xf32> to vector<16x32xf32>
    %20 = arith.addf %17, %19 : vector<16x32xf32>
    %cst_19 = arith.constant 0.000000e+00 : f32
    %21 = vector.broadcast %cst_19 : f32 to vector<16x32xf32>
    %22 = arith.maximumf %20, %21 : vector<16x32xf32>
    %c0_20 = arith.constant 0 : index
    %c0_21 = arith.constant 0 : index
    %23 = vector.load %arg9[%c0_20, %c0_21] : memref<1x32xf32, #tpu.memory_space<vmem>>, vector<1x32xf32>
    %24 = vector.broadcast %23 : vector<1x32xf32> to vector<16x32xf32>
    %25 = arith.mulf %22, %24 : vector<16x32xf32>
    %cst_22 = arith.constant dense<0.000000e+00> : vector<16xf32>
    %26 = vector.multi_reduction <add>, %25, %cst_22 [1] : vector<16x32xf32> to vector<16xf32>
    %27 = vector.shape_cast %26 : vector<16xf32> to vector<16x1xf32>
    %c0_23 = arith.constant 0 : index
    %c0_24 = arith.constant 0 : index
    %28 = vector.load %arg10[%c0_23, %c0_24] : memref<1x1xf32, #tpu.memory_space<vmem>>, vector<1x1xf32>
    %29 = vector.extract %28[0, 0] : f32 from vector<1x1xf32>
    %30 = vector.broadcast %29 : f32 to vector<16x1xf32>
    %31 = arith.addf %27, %30 : vector<16x1xf32>
    %c0_25 = arith.constant 0 : index
    %c0_26 = arith.constant 0 : index
    %32 = vector.load %arg11[%c0_25, %c0_26] : memref<16x1xf32, #tpu.memory_space<vmem>>, vector<16x1xf32>
    tpu.vector_store %arg11[%c0_25, %c0_26], %31 {strides = array<i32>} : memref<16x1xf32, #tpu.memory_space<vmem>>, vector<16x1xf32>,
    return
  }
  func.func @transform_0(%arg0: i32) -> (i32, i32) {
    %c0_i32 = arith.constant 0 : i32
    %c0_i32_0 = arith.constant 0 : i32
    return %arg0, %c0_i32 : i32, i32
  }
  func.func @transform_1(%arg0: i32) -> (i32, i32) {
    %c0_i32 = arith.constant 0 : i32
    %c0_i32_0 = arith.constant 0 : i32
    return %arg0, %c0_i32 : i32, i32
  }
  func.func @transform_2(%arg0: i32) -> (i32, i32) {
    %c0_i32 = arith.constant 0 : i32
    %c0_i32_0 = arith.constant 0 : i32
    %c0_i32_1 = arith.constant 0 : i32
    return %c0_i32, %c0_i32_0 : i32, i32
  }
  func.func @transform_3(%arg0: i32) -> (i32, i32) {
    %c0_i32 = arith.constant 0 : i32
    %c0_i32_0 = arith.constant 0 : i32
    %c0_i32_1 = arith.constant 0 : i32
    return %c0_i32, %c0_i32_0 : i32, i32
  }
  func.func @transform_4(%arg0: i32) -> (i32, i32) {
    %c0_i32 = arith.constant 0 : i32
    %c0_i32_0 = arith.constant 0 : i32
    %c0_i32_1 = arith.constant 0 : i32
    return %c0_i32, %c0_i32_0 : i32, i32
  }
  func.func @transform_5(%arg0: i32) -> (i32, i32) {
    %c0_i32 = arith.constant 0 : i32
    %c0_i32_0 = arith.constant 0 : i32
    %c0_i32_1 = arith.constant 0 : i32
    return %c0_i32, %c0_i32_0 : i32, i32
  }
  func.func @transform_6(%arg0: i32) -> (i32, i32) {
    %c0_i32 = arith.constant 0 : i32
    %c0_i32_0 = arith.constant 0 : i32
    %c0_i32_1 = arith.constant 0 : i32
    return %c0_i32, %c0_i32_0 : i32, i32
  }
  func.func @transform_7(%arg0: i32) -> (i32, i32) {
    %c0_i32 = arith.constant 0 : i32
    %c0_i32_0 = arith.constant 0 : i32
    %c0_i32_1 = arith.constant 0 : i32
    return %c0_i32, %c0_i32_0 : i32, i32
  }
  func.func @transform_8(%arg0: i32) -> (i32, i32) {
    %c0_i32 = arith.constant 0 : i32
    %c0_i32_0 = arith.constant 0 : i32
    %c0_i32_1 = arith.constant 0 : i32
    return %c0_i32, %c0_i32_0 : i32, i32
  }
  func.func @transform_9(%arg0: i32) -> (i32, i32) {
    %c0_i32 = arith.constant 0 : i32
    %c0_i32_0 = arith.constant 0 : i32
    %c0_i32_1 = arith.constant 0 : i32
    return %c0_i32, %c0_i32_0 : i32, i32
  }
  func.func @transform_10(%arg0: i32) -> (i32, i32) {
    %c0_i32 = arith.constant 0 : i32
    %c0_i32_0 = arith.constant 0 : i32
    return %arg0, %c0_i32 : i32, i32
  }
}

</mosaic_0001>

<bundles_post_ra>
// kernel: tpu_custom_call.1
= control target key start
LH: loop header
LB: loop body
LE: loop exit
PB: predicated region body
PF: predicated region fallthrough
CT: control target
= control target key end

     0   :  { %s583_s0 = inlined_call_operand.vmem [shape: bf16[16,32], index: 0, kind: input, shape index: {}]   ;;  %s584_s1 = inlined_call_operand.hbm [shape: bf16[16,16], index: 1, kind: input, shape index: {}]   ;;  %s585_s2 = inlined_call_operand.vmem [shape: bf16[32,16], index: 2, kind: input, shape index: {}]   ;;  %s586_s3 = inlined_call_operand.hbm [shape: bf16[16,32], index: 3, kind: input, shape index: {}]   ;;  %s587_s4 = inlined_call_operand.vmem [shape: bf16[16,32], index: 4, kind: input, shape index: {}]   ;;  %s588_s5 = inlined_call_operand.vmem [shape: f32[1,32], index: 5, kind: input, shape index: {}]   ;;  %s589_s6 = inlined_call_operand.vmem [shape: bf16[32,32], index: 6, kind: input, shape index: {}]   ;;  %s590_s7 = inlined_call_operand.vmem [shape: f32[1,32], index: 7, kind: input, shape index: {}]   ;;  %s591_s8 = inlined_call_operand.vmem [shape: f32[1,32], index: 8, kind: input, shape index: {}]   ;;  %s592_s9 = inlined_call_operand.<no memory space> [shape: f32[1,1], index: 9, kind: input, shape index: {}]   ;;  %s593_s10 = inlined_call_operand.vmem [shape: f32[16,1], index: 10, kind: output, shape index: {}]  }
   0x1   :  { %v15_v0 = vstv %s592_s9 }
   0x2   :  { %16 = vst [vmem:[#allocation2] sm:$0x1] %v15_v0 }
   0x3   :  { %17 = vsyncpa [#allocation4], 0 }
   0x4   :  { %18 = vsyncpa [#allocation6], 0  ;;  %s470_s15 = smov [#allocation3]  }
   0x5   :  { %s26_s16 = sshll.u32 %s470_s15, 4  ;;  %s27_s16 = int_to_ptr.vmem [resolvable:$true] %s26_s16 }
   0x6   :  { %s434_s17 = scalar_lea.vmem %s27_s16, 128  ;;  %p439_p1 = scmp.lt.s32.totalorder %s27_s16, %s27_s16 }
   0x7   :  { %p435_p0 = scmp.ne.s32.totalorder %s27_s16, %s434_s17  ;;  %p440_p2 = scmp.lt.s32.totalorder %s434_s17, %s434_s17 }
   0x9   :  { %p441_p3 = por %p440_p2, %p439_p1 }
   0xb   :  { %p442_p4 = pnand %p441_p3, %p435_p0 }
   0xd   :  { %445 = shalt.err (!%p442_p4)
}
   0xe   :  { %s471_s18 = smov 64   ;;  %s472_s19 = smov 4  }
   0xf   :  { %32 = dma.hbm_to_vmem [thread:$0]  %s584_s1, 128, %s27_s16, [#allocation4], %s471_s18, %s471_s18, %s472_s19  }
  0x10   :  { %s473_s9 = smov [#allocation5]  }
  0x11   :  { %s40_s22 = sshll.u32 %s473_s9, 4  ;;  %s41_s22 = int_to_ptr.vmem [resolvable:$true] %s40_s22 }
  0x12   :  { %s454_s23 = scalar_lea.vmem %s41_s22, 128  ;;  %p459_p6 = scmp.lt.s32.totalorder %s41_s22, %s41_s22 }
  0x13   :  { %p455_p5 = scmp.ne.s32.totalorder %s41_s22, %s454_s23  ;;  %p460_p7 = scmp.lt.s32.totalorder %s454_s23, %s454_s23 }
  0x15   :  { %p461_p8 = por %p460_p7, %p459_p6 }
  0x17   :  { %p462_p9 = pnand %p461_p8, %p455_p5 }
  0x19   :  { %465 = shalt.err (!%p462_p9)
}
  0x1a   :  { %46 = dma.hbm_to_vmem [thread:$0]  %s586_s3, 128, %s41_s22, [#allocation6], %s471_s18, %s471_s18, %s472_s19  }
  0x1b   :  { %466 = dma.done.wait [#allocation4], 128  }
  0x1c   :  { %467 = vsyncadd [#allocation4], 4294967168 }
  0x1d   :  { %468 = dma.done.wait [#allocation6], 128  }
  0x1e   :  { %469 = vsyncadd [#allocation6], 4294967168  ;;  %v474_v1 = vmov 0.0   ;;  %vm475_vm0 = vmmov 0   ;;  %v418_v2 = vld [vmem:[%s585_s2 + $0x8] sm:$0xff]   ;;  %v419_v3 = vld [vmem:[%s585_s2] sm:$0xff]  }
  0x1f   :  { %382 = vmatprep.subr.bf16.mxu0 %v474_v1  ;;  %386 = vmatprep.mubr.msk.bf16.mxu0 %vm475_vm0, %v474_v1  ;;  %v420_v4 = vld [vmem:[%s583_s0] sm:$0xff]   ;;  %vm89_vm1 = vcmask 261120   ;;  %vm152_vm2 = vcmask 130048   ;;  %v423_v7 = vld [vmem:[#allocation5] sm:$0xff]   ;;  %vm348_vm3 = vcmask 7168  }
  0x20   :  { %390 = vmatprep.subr.bf16.mxu1 %v474_v1  ;;  %392 = vmatprep.mubr.msk.bf16.mxu1 %vm475_vm0, %v474_v1  ;;  %v421_v5 = vld [vmem:[%s587_s4] sm:$0xff]   ;;  %v424_v17 = vld [vmem:[%s589_s6 + $0x8] sm:$0xff]  }
  0x21   :  { %383 = vmatpush3.bf16.msra.mxu0 %v418_v2  ;;  %v422_v6 = vld [vmem:[#allocation3] sm:$0xff]   ;;  %391 = vmatpush3.bf16.msra.mxu1 %v421_v5  ;;  %v366_v21 = vld [vmem:[%s588_s5] ss:$0 sm:$0xff] }
  0x22   :  { %384 = vmatprep.subr.bf16.mxu0 %v474_v1  ;;  %396 = vmatprep.subr.bf16.mxu1 %v474_v1  ;;  %v425_v18 = vld [vmem:[%s589_s6] sm:$0xff]  }
  0x23   :  { %v343_v31 = vld [vmem:[#allocation2] sm:$0x1] }
  0x24   :  { %393 = vmatmul.mubr.msk.bf16.vlgmr.msra.gmra.mxu1 %vm152_vm2, %v422_v6  ;;  %410 = vpush %v343_v31  ;;  %v367_v32 = vld [vmem:[%s590_s7] ss:$0 sm:$0xff] }
  0x25   :  { %385 = vmatpush3.bf16.msra.mxu0 %v419_v3  ;;  %397 = vmatpush3.bf16.msra.mxu1 %v423_v7  ;;  %v371_v36 = vld [vmem:[%s591_s8] ss:$0 sm:$0xff] }
  0x26   :  { %402 = vmatprep.subr.bf16.mxu0 %v474_v1  ;;  %398 = vmatprep.mubr.msk.bf16.mxu1 %vm475_vm0, %v474_v1 }
  0x28   :  { %387 = vmatmul.mubr.msk.bf16.vlgmr.msra.gmra.mxu0 %vm89_vm1, %v420_v4 }
  0x29   :  { %406 = vmatprep.mubr.msk.bf16.mxu0 %vm475_vm0, %v474_v1  ;;  %403 = vmatpush3.bf16.msra.mxu0 %v424_v17 }
  0x2a   :  { %404 = vmatprep.subr.bf16.mxu0 %v474_v1 }
  0x2d   :  { %405 = vmatpush3.bf16.msra.mxu0 %v425_v18 }
  0x55   :  { %s411_s7 = spop %410 }
  0x56   :  { %v345_v46 = vstv %s411_s7 }
  0xe4   :  { %v190_v8 = vpop.f32.mrf.mxu1 }
  0xe6   :  { %v394_v10 = vpop.f32.mrf.mxu1 }
  0xe8   :  { %v127_v9 = vpop.f32.mrf.mxu0  ;;  %v193_v12 = vpop.f32.mrf.mxu1 }
  0xea   :  { %v388_v11 = vpop.f32.mrf.mxu0  ;;  %v395_v15 = vpop.f32.mrf.mxu1 }
  0xec   :  { %v130_v13 = vpop.f32.mrf.mxu0 }
  0xed   :  { %v134_v14 = vpack.c.bf16 %v130_v13, %v127_v9 }
  0xee   :  { %v389_v16 = vpop.f32.mrf.mxu0 }
  0xef   :  { %399 = vmatmul.mubr.msk.bf16.vlgmr.msra.gmra.mxu1 %vm152_vm2, %v134_v14 }
 0x1af   :  { %v240_v19 = vpop.f32.mrf.mxu1 }
 0x1b0   :  { %v241_v20 = vadd.f32 %v240_v19, %v190_v8 }
 0x1b1   :  { %v400_v22 = vpop.f32.mrf.mxu1 }
 0x1b2   :  { %v254_v24 = vadd.f32 %v366_v21, %v241_v20 }
 0x1b3   :  { %v243_v23 = vpop.f32.mrf.mxu1 }
 0x1b4   :  { %v244_v25 = vadd.f32 %v243_v23, %v193_v12  ;;  %v256_v28 = vmax.f32 %v254_v24, 0.0 }
 0x1b5   :  { %v401_v26 = vpop.f32.mrf.mxu1 }
 0x1b6   :  { %v255_v27 = vadd.f32 %v366_v21, %v244_v25 }
 0x1b8   :  { %v257_v29 = vmax.f32 %v255_v27, 0.0 }
 0x1ba   :  { %v258_v30 = vpack.c.bf16 %v257_v29, %v256_v28 }
 0x1bc   :  { %407 = vmatmul.mubr.msk.bf16.vlgmr.msra.gmra.mxu0 %vm89_vm1, %v258_v30 }
 0x27c   :  { %v319_v33 = vpop.f32.mrf.mxu0 }
 0x27d   :  { %v320_v34 = vadd.f32 %v367_v32, %v319_v33 }
 0x27e   :  { %v408_v35 = vpop.f32.mrf.mxu0 }
 0x27f   :  { %v326_v37 = vmax.f32 %v320_v34, 0.0 }
 0x280   :  { %v322_v38 = vpop.f32.mrf.mxu0 }
 0x281   :  { %v323_v39 = vadd.f32 %v367_v32, %v322_v38  ;;  %v335_v40 = vmul.f32 %v371_v36, %v326_v37 }
 0x282   :  { %v409_v41 = vpop.f32.mrf.mxu0 }
 0x283   :  { %v327_v42 = vmax.f32 %v323_v39, 0.0  ;;  %v337_v43 = vsel %vm89_vm1, %v335_v40, 0.0 }
 0x284   :  { %338 = vadd.xlane.f32.xlu0 %v337_v43 }
 0x285   :  { %v336_v44 = vmul.f32 %v371_v36, %v327_v42 }
 0x287   :  { %v340_v45 = vsel %vm89_vm1, %v336_v44, 0.0 }
 0x288   :  { %341 = vadd.xlane.f32.xlu0 %v340_v45 }
 0x30d   :  { %v339_v47 = vpop.xlane.xlu0 %338 }
 0x30e   :  { %v346_v48 = vadd.f32 %v345_v46, %v339_v47 }
 0x310   :  { %349 = vst.msk [vmem:[%s593_s10] sm:$0xff] %vm348_vm3, %v346_v48 }
 0x311   :  { %v342_v49 = vpop.xlane.xlu0 %341 }
 0x312   :  { %v347_v50 = vadd.f32 %v345_v46, %v342_v49 }
 0x314   :  { %350 = vst.msk [vmem:[%s593_s10 + $0x8] sm:$0xff] %vm348_vm3, %v347_v50 }
 0x315   :  { %355 = vsyncpa [#allocation4], 1 }
 0x316   :  { %356 = vsyncpa [#allocation6], 1 }

</bundles_post_ra>
